<compile_context>
chip_gen: v6e
topology: v6e:2x2x1
jax: 0.10.0
libtpu: 0.0.40
codegen_flags: <defaults>
</compile_context>

<pallas_src>
import jax
import jax.numpy as jnp
from jax import lax
from jax.experimental import pallas as pl
from jax.experimental.pallas import tpu as pltpu

EPS = 1e-5
LANE = 128


def conv_stats_kernel(p_ref, w_ref, st_ref):
    """Per M-tile: transposed-conv matmul (all 4 phases fused) -> BN partial sums."""
    y = jnp.dot(p_ref[...], w_ref[...], preferred_element_type=jnp.float32)
    s1 = jnp.sum(y, axis=0, keepdims=True)        # per-column sum
    s2 = jnp.sum(y * y, axis=0, keepdims=True)    # per-column sum of squares
    pad = jnp.zeros((6, y.shape[1]), jnp.float32)
    st_ref[0] = jnp.concatenate([s1, s2, pad], axis=0)


def conv_bn_relu_kernel(p_ref, w_ref, sc_ref, sh_ref, o_ref):
    """Per M-tile: recompute conv matmul, fuse BN normalize (scale/shift) + ReLU."""
    y = jnp.dot(p_ref[...], w_ref[...], preferred_element_type=jnp.float32)
    o_ref[...] = jnp.maximum(y * sc_ref[...] + sh_ref[...], 0.0)


def _round_up(x, m):
    return (x + m - 1) // m * m


def tr_conv_bn_relu(x_nchw, weight, gamma, beta, *, stride, padding,
                    output_padding, tile_m=512):
    """ConvTranspose2d(bias=False) -> BatchNorm2d(training stats) -> ReLU."""
    N, Cin, H, W = x_nchw.shape
    Cin_w, Cout, K, Kw = weight.shape
    assert Cin_w == Cin and Kw == K
    # Phase decomposition below is hard-coded for the standard 2x upsampling
    # configuration this block is used with.
    # TODO(synk): generalize phase decomposition to arbitrary stride/padding/K.
    assert (stride, padding, output_padding, K) == (2, 1, 1, 3)
    s = stride
    Ho = (H - 1) * s - 2 * padding + K + output_padding      # = 2H
    Wo = (W - 1) * s - 2 * padding + K + output_padding      # = 2W
    R = 2                        # input window per output phase = ceil(K/s)
    KKC = R * R * Cin            # fused contraction depth
    CC = s * s * Cout            # real phase-major output columns
    CP4 = _round_up(CC, LANE)    # ONE lane-dense pad across all 4 phases
    Mp = N * H * W               # rows per phase (N*Ho*Wo == s*s*Mp)

    # ---------------- wrapper glue (pure JAX, layout only) ----------------
    # NCHW -> NHWC; pad 1 on the high side so every output's RxR window of the
    # ORIGINAL (non-dilated) input is in bounds.
    x = jnp.transpose(x_nchw, (0, 2, 3, 1))
    xp = jnp.pad(x, ((0, 0), (0, R - 1), (0, R - 1), (0, 0)))
    # One shared (Mp, R*R*Cin) patch matrix for all 4 output phases.
    patches = jnp.stack(
        [xp[:, dh:dh + H, dw:dw + W, :] for dh in range(R) for dw in range(R)],
        axis=3).reshape(Mp, KKC).astype(jnp.bfloat16)

    # Phase weights.  Transposed conv: out[o] += x[i] * w[k], k = o + p - i*s,
    # weight (Cin, Cout, kh, kw) indexed directly (no spatial flip).
    # Columns are (qh, qw, cout) phase-major, padded once to CP4.
    w_all = jnp.zeros((s, s, R, R, Cin, Cout), jnp.float32)
    for qh in range(s):
        for dh in range(R):
            kh = qh + padding - s * dh
            if not (0 <= kh < K):
                continue
            for qw in range(s):
                for dw in range(R):
                    kw = qw + padding - s * dw
                    if not (0 <= kw < K):
                        continue
                    w_all = w_all.at[qh, qw, dh, dw, :, :].set(weight[:, :, kh, kw])
    # rows = (dh, dw, cin) to match patches; cols = (qh, qw, cout) phase-major.
    w_all = w_all.transpose(2, 3, 4, 0, 1, 5).reshape(KKC, CC)
    w_all = jnp.pad(w_all, ((0, 0), (0, CP4 - CC))).astype(jnp.bfloat16)

    # -------- tile sizing: VMEM budget + n_mt >= 2, pad M with zero rows ----
    tm = tile_m
    while tm > 8 and (2 * tm * KKC * 2 + 2 * tm * CP4 * 4
                      + KKC * CP4 * 2) > 24 * 1024 * 1024:
        tm //= 2                                 # keep well under v7x's 64 MiB VMEM
    if Mp <= tm:
        tm = max(8, _round_up(pl.cdiv(Mp, 2), 8))   # >=2 grid steps when possible
    Mp_pad = _round_up(Mp, tm)
    n_mt = Mp_pad // tm
    if Mp_pad > Mp:
        patches = jnp.pad(patches, ((0, Mp_pad - Mp), (0, 0)))  # zero rows: BN-safe

    cparams = pltpu.CompilerParams(
        dimension_semantics=("parallel",),
        vmem_limit_bytes=32 * 1024 * 1024)

    # -------- pass 1: stats only (per-tile BN partial sums), tiled over M ---
    stats = pl.pallas_call(
        conv_stats_kernel,
        out_shape=jax.ShapeDtypeStruct((n_mt, 8, CP4), jnp.float32),
        grid_spec=pltpu.PrefetchScalarGridSpec(
            num_scalar_prefetch=0,
            grid=(n_mt,),
            in_specs=[
                pl.BlockSpec((tm, KKC), lambda i: (i, 0)),
                pl.BlockSpec((KKC, CP4), lambda i: (0, 0)),
            ],
            out_specs=pl.BlockSpec((1, 8, CP4), lambda i: (i, 0, 0)),
        ),
        compiler_params=cparams,
    )(patches, w_all)

    # ---- tiny global BN reduction (biased/training variance) in JAX -------
    # TODO(synk): switch to shifted/centered moments if s2/cnt - mean^2
    # cancellation matters at production activation sizes.
    cnt = jnp.float32(N * Ho * Wo)
    s1 = stats[:, 0, :CC].sum(axis=0).reshape(s * s, Cout).sum(axis=0)
    s2 = stats[:, 1, :CC].sum(axis=0).reshape(s * s, Cout).sum(axis=0)
    mean = s1 / cnt
    var = jnp.maximum(s2 / cnt - mean * mean, 0.0)
    scale = gamma.astype(jnp.float32) * lax.rsqrt(var + EPS)
    shift = beta.astype(jnp.float32) - mean * scale
    scale_all = jnp.pad(jnp.tile(scale, s * s), (0, CP4 - CC)).reshape(1, CP4)
    shift_all = jnp.pad(jnp.tile(shift, s * s), (0, CP4 - CC)).reshape(1, CP4)

    # -------- pass 2: recompute matmul, fused normalize + ReLU --------------
    out = pl.pallas_call(
        conv_bn_relu_kernel,
        out_shape=jax.ShapeDtypeStruct((Mp_pad, CP4), jnp.float32),
        grid_spec=pltpu.PrefetchScalarGridSpec(
            num_scalar_prefetch=0,
            grid=(n_mt,),
            in_specs=[
                pl.BlockSpec((tm, KKC), lambda i: (i, 0)),
                pl.BlockSpec((KKC, CP4), lambda i: (0, 0)),
                pl.BlockSpec((1, CP4), lambda i: (0, 0)),
                pl.BlockSpec((1, CP4), lambda i: (0, 0)),
            ],
            out_specs=pl.BlockSpec((tm, CP4), lambda i: (i, 0)),
        ),
        compiler_params=cparams,
    )(patches, w_all, scale_all, shift_all)

    # -------- reassemble the 4 phases into NCHW (real rows/channels only) ----
    o = out[:Mp, :CC].reshape(N, H, W, s, s, Cout)     # (n, h, w, qh, qw, c)
    o = o.transpose(0, 5, 1, 3, 2, 4).reshape(N, Cout, Ho, Wo)
    return o


def reference(x_nchw, weight, gamma, beta, *, stride, padding, output_padding):
    """Pure-XLA reference: ConvTranspose2d -> BatchNorm2d(train) -> ReLU."""
    Cin, Cout, K, _ = weight.shape
    w_conv = jnp.flip(weight, (2, 3)).transpose(1, 0, 2, 3)   # (Cout, Cin, K, K)
    pad_lo = K - 1 - padding
    pad_hi = K - 1 - padding + output_padding
    y = lax.conv_general_dilated(
        x_nchw, w_conv, window_strides=(1, 1),
        padding=[(pad_lo, pad_hi), (pad_lo, pad_hi)],
        lhs_dilation=(stride, stride),
        dimension_numbers=('NCHW', 'OIHW', 'NCHW'),
        precision=lax.Precision.HIGHEST)
    mean = y.mean(axis=(0, 2, 3), keepdims=True)
    var = ((y - mean) ** 2).mean(axis=(0, 2, 3), keepdims=True)
    yn = (y - mean) * lax.rsqrt(var + EPS)
    yn = yn * gamma.reshape(1, -1, 1, 1) + beta.reshape(1, -1, 1, 1)
    return jnp.maximum(yn, 0.0)


if __name__ == "__main__":
    N, Cin, Cout, H, W = 2, 4, 8, 16, 16
    K, stride, padding, output_padding = 3, 2, 1, 1

    key = jax.random.PRNGKey(0)
    k1, k2, k3, k4 = jax.random.split(key, 4)
    x = jax.random.normal(k1, (N, Cin, H, W), jnp.float32)
    # ConvTranspose2d weight shape: (in_channels, out_channels, kH, kW), bias=False.
    weight = 0.1 * jax.random.normal(k2, (Cin, Cout, K, K), jnp.float32)
    # BatchNorm2d affine params (gamma, beta) per output channel.
    gamma = 1.0 + 0.1 * jax.random.normal(k3, (Cout,), jnp.float32)
    beta = 0.1 * jax.random.normal(k4, (Cout,), jnp.float32)

    out = tr_conv_bn_relu(x, weight, gamma, beta, stride=stride,
                          padding=padding, output_padding=output_padding)
    out = jax.block_until_ready(out)

    Ho = (H - 1) * stride - 2 * padding + K + output_padding
    assert out.shape == (N, Cout, Ho, Ho), out.shape

    ref = reference(x, weight, gamma, beta, stride=stride,
                    padding=padding, output_padding=output_padding)
    max_err = float(jnp.max(jnp.abs(out - ref)))
    # bf16 MXU inputs (f32 accumulation) vs f32-HIGHEST reference: 2e-2 tolerance.
    assert jnp.allclose(out, ref, atol=2e-2, rtol=2e-2), max_err

    print("KERNEL_OK")
</pallas_src>

<mosaic_0001>
module attributes {stable_mosaic.version = 11 : i64} {
  func.func @conv_stats_kernel(%arg0: i32, %arg1: memref<256x16xbf16, #tpu.memory_space<vmem>>, %arg2: memref<16x128xbf16, #tpu.memory_space<vmem>>, %arg3: memref<1x8x128xf32, #tpu.memory_space<vmem>>) attributes {dimension_semantics = [#tpu.dimension_semantics<parallel>], iteration_bounds = array<i64: 2>, scalar_prefetch = 0 : i64, scratch_operands = 0 : i64, tpu.core_type = #tpu.core_type<tc>, window_params = [{transform_indices = @transform_0, window_bounds = array<i64: 256, 16>}, {pipeline_mode = #tpu.pipeline_mode<synchronous>, transform_indices = @transform_1, window_bounds = array<i64: 16, 128>}, {transform_indices = @transform_2, window_bounds = array<i64: 1, 8, 128>}]} {
    %c0 = arith.constant 0 : index
    %c0_0 = arith.constant 0 : index
    %0 = vector.load %arg1[%c0, %c0_0] : memref<256x16xbf16, #tpu.memory_space<vmem>>, vector<256x16xbf16>
    %c0_1 = arith.constant 0 : index
    %c0_2 = arith.constant 0 : index
    %1 = vector.load %arg2[%c0_1, %c0_2] : memref<16x128xbf16, #tpu.memory_space<vmem>>, vector<16x128xbf16>
    %cst = arith.constant dense<0.000000e+00> : vector<256x128xf32>
    %2 = tpu.matmul %0, %1, %cst {dimension_numbers = #tpu.dot_dimension_numbers<[1], [0], [0], [1], [0, 0, 1, 1], [], []>} : vector<256x16xbf16>, vector<16x128xbf16>, vector<256x128xf32> -> vector<256x128xf32>
    %cst_3 = arith.constant dense<0.000000e+00> : vector<128xf32>
    %3 = vector.multi_reduction <add>, %2, %cst_3 [0] : vector<256x128xf32> to vector<128xf32>
    %4 = vector.shape_cast %3 : vector<128xf32> to vector<1x128xf32>
    %5 = arith.mulf %2, %2 : vector<256x128xf32>
    %cst_4 = arith.constant dense<0.000000e+00> : vector<128xf32>
    %6 = vector.multi_reduction <add>, %5, %cst_4 [0] : vector<256x128xf32> to vector<128xf32>
    %7 = vector.shape_cast %6 : vector<128xf32> to vector<1x128xf32>
    %cst_5 = arith.constant 0.000000e+00 : f32
    %8 = vector.broadcast %cst_5 : f32 to vector<6x128xf32>
    %9 = tpu.concatenate %4, %7, %8 in 0 : vector<1x128xf32>, vector<1x128xf32>, vector<6x128xf32> -> vector<8x128xf32>
    %c0_6 = arith.constant 0 : index
    %c0_7 = arith.constant 0 : index
    %c0_8 = arith.constant 0 : index
    %10 = vector.load %arg3[%c0_6, %c0_7, %c0_8] : memref<1x8x128xf32, #tpu.memory_space<vmem>>, vector<1x8x128xf32>
    %11 = vector.shape_cast %10 : vector<1x8x128xf32> to vector<8x128xf32>
    %12 = vector.shape_cast %9 : vector<8x128xf32> to vector<1x8x128xf32>
    tpu.vector_store %arg3[%c0_6, %c0_7, %c0_8], %12 {strides = array<i32>} : memref<1x8x128xf32, #tpu.memory_space<vmem>>, vector<1x8x128xf32>,
    return
  }
  func.func @transform_0(%arg0: i32) -> (i32, i32) {
    %c0_i32 = arith.constant 0 : i32
    %c0_i32_0 = arith.constant 0 : i32
    return %arg0, %c0_i32 : i32, i32
  }
  func.func @transform_1(%arg0: i32) -> (i32, i32) {
    %c0_i32 = arith.constant 0 : i32
    %c0_i32_0 = arith.constant 0 : i32
    %c0_i32_1 = arith.constant 0 : i32
    return %c0_i32, %c0_i32_0 : i32, i32
  }
  func.func @transform_2(%arg0: i32) -> (i32, i32, i32) {
    %c0_i32 = arith.constant 0 : i32
    %c0_i32_0 = arith.constant 0 : i32
    %c0_i32_1 = arith.constant 0 : i32
    return %arg0, %c0_i32, %c0_i32_0 : i32, i32, i32
  }
}

</mosaic_0001>

<bundles_post_ra>
// kernel: tpu_custom_call.1
= control target key start
LH: loop header
LB: loop body
LE: loop exit
PB: predicated region body
PF: predicated region fallthrough
CT: control target
= control target key end

     0   :  { %7 = vsyncpa [#allocation3], 0  ;;  %s1034_s0 = inlined_call_operand.vmem [shape: bf16[512,16], index: 0, kind: input, shape index: {}]   ;;  %s1035_s1 = inlined_call_operand.vmem [shape: bf16[16,128], index: 1, kind: input, shape index: {}]   ;;  %s1036_s2 = inlined_call_operand.hbm [shape: f32[2,8,128], index: 2, kind: output, shape index: {}]  }
   0x1   :  { %9 = vsyncpa [#allocation3 + $0x1], 0  ;;  %s890_s9 = smov 0   ;;  %s892_s10 = smov 0  }
   0x2   :  { %s894_s11 = smov 0   ;;  %s896_s12 = smov 0  }
   0x3 LB: > { %s911_s13 = sadd.s32 4294967295, %s872_s12   ;;  %s659_s14 = sadd.s32 4294967294, %s872_s12   ;;  %s872_s12 = sphi %s896_s12, %s1042_s12   ;;  %s868_s11 = sphi %s894_s11, %s1041_s11   ;;  %s864_s10 = sphi %s892_s10, %s1040_s10   ;;  %s860_s9 = sphi %s890_s9, %s1039_s9  }
   0x4   : > { %s915_s15 = sadd.s32 1, %s872_s12   ;;  %s69_s16 = sadd.s32 1, %s868_s11 }
   0x5   : > { %s66_s17 = ssub.s32 %s872_s12, %s915_s15  ;;  %p79_p0 = scmp.ne.s32.totalorder %s868_s11, %s864_s10 }
   0x6   : > { %p67_p1 = scmp.eq.s32.totalorder %s66_s17, 0  ;;  %p80_p2 = scmp.eq.s32.totalorder %s911_s13, 1 }
   0x7   : > { %p85_p3 = scmp.ne.s32.totalorder %s864_s10, %s860_s9  ;;  %p86_p4 = scmp.eq.s32.totalorder %s659_s14, 1 }
   0x8   : > { %s926_s18 = scalar_select %p67_p1, %s868_s11, %s69_s16  }
   0x9   : > { %p928_p5 = por %p80_p2, %p79_p0  ;;  %p932_p6 = por %p86_p4, %p85_p3 }
   0xa   : > { %p662_p7 = scmp.ge.s32.totalorder %s872_s12, 1  ;;  %p116_p8 = scmp.lt.s32.totalorder %s872_s12, 3 }
   0xc   : > { %p117_p9 = pnand %p662_p7, %p116_p8 }
   0xd   : > { %s664_s23 = sshll.u32 (!%p117_p9), %s911_s13, 5  ;;  %s135_s28 = sand.u32 (!%p117_p9), 1, %s864_s10  }
   0xe   : > { %120 = sbr.rel (%p117_p9) target bundleno = 314 (0x13a), region = 28  ;;  %p139_p10 = scmp.lt.s32.totalorder (!%p117_p9), %s664_s23, 63 }
   0xf   : > { %s663_s29 = sshll.u32 (!%p117_p9), %s135_s28, 3  ;;  %s700_s30 = sshll.u32 (!%p117_p9), %s911_s13, 7 }
  0x10   : > { %s137_s3 = scalar_lea.vmem (!%p117_p9), [#allocation2], %s663_s29  ;;  %s999_s7 = scalar_lea.hbm (!%p117_p9), %s1036_s2, %s700_s30 }
  0x11   : > { %s600_s4 = sshll.u32 (!%p117_p9), %s137_s3, 4  ;;  %s587_s8 = scalar_lea.sflag (!%p117_p9), [#allocation3], %s135_s28  ;;  %s601_s4 = int_to_ptr.vmem [resolvable:$true] %s600_s4 }
  0x12   : > { %s812_s14 = scalar_lea.vmem (!%p117_p9), %s601_s4, 128  ;;  %s874_s13 = smov (!%p117_p9), [#allocation2]  }
  0x13   : > { %v795_v0 = vld [vmem:[%s1035_s1] sm:$0xff]   ;;  %s1044_s23 = smov (!%p139_p10, %s664_s23), 63  ;;  %vm265_vm0 = vcmask 130048   ;;  %vm581_vm1 = vcmask 1040384   ;;  %vm583_vm2 = vcmask 1041408   ;;  %p813_p11 = scmp.ne.s32.totalorder %s601_s4, %s812_s14 }
  0x14   : > { %720 = vmatprep.subr.bf16.mxu0 %v795_v0  ;;  %754 = vmatprep.subr.bf16.mxu1 %v795_v0  ;;  %s665_s24 = sshll.u32 %s1044_s23, 2  ;;  %s816_s16 = sshll.u32 %s874_s13, 4  ;;  %s817_s16 = int_to_ptr.vmem [resolvable:$false] %s816_s16 }
  0x15   : > { %721 = vmatpush3.bf16.msra.mxu0 %v795_v0  ;;  %755 = vmatpush3.bf16.msra.mxu1 %v795_v0  ;;  %s945_s27 = scalar_lea.vmem %s1034_s0, %s665_s24  ;;  %p814_p12 = pnand %p813_p11, %p928_p5 }
  0x16   : > { %v796_v1 = vld [vmem:[%s945_s27] sm:$0xff]   ;;  %v797_v2 = vld [vmem:[%s945_s27 + $0x8] sm:$0xff]   ;;  %v798_v3 = vld [vmem:[%s945_s27 + $0x10] sm:$0xff]   ;;  %s818_s17 = scalar_lea.vmem %s817_s16, 256  ;;  %p819_p0 = scmp.lt.s32.totalorder %s601_s4, %s817_s16 }
  0x17   : > { %722 = vmatprep.mubr.msk.bf16.mxu0 %vm265_vm0, %v796_v1  ;;  %v799_v4 = vld [vmem:[%s945_s27 + $0x18] sm:$0xff]   ;;  %v800_v5 = vld [vmem:[%s945_s27 + $0x20] sm:$0xff]   ;;  %v805_v7 = vld [vmem:[%s945_s27 + $0x48] sm:$0xff]   ;;  %p815_p13 = pneg %p814_p12  ;;  %p820_p1 = scmp.lt.s32.totalorder %s818_s17, %s812_s14 }
  0x18   : > { %723 = vmatmul.mubr.msk.bf16.vlgmr.msra.gmra.mxu0 %vm265_vm0, %v797_v2  ;;  %v804_v6 = vld [vmem:[%s945_s27 + $0x40] sm:$0xff]   ;;  %v806_v8 = vld [vmem:[%s945_s27 + $0x50] sm:$0xff]   ;;  %v801_v9 = vld [vmem:[%s945_s27 + $0x28] sm:$0xff]  }
  0x19   : > { %726 = vmatprep.mubr.msk.bf16.mxu0 %vm265_vm0, %v798_v3  ;;  %738 = vmatprep.mubr.msk.bf16.mxu1 %vm265_vm0, %v804_v6  ;;  %v807_v10 = vld [vmem:[%s945_s27 + $0x58] sm:$0xff]   ;;  %v802_v11 = vld [vmem:[%s945_s27 + $0x30] sm:$0xff]   ;;  %v808_v12 = vld [vmem:[%s945_s27 + $0x60] sm:$0xff]   ;;  %p821_p2 = por %p820_p1, %p819_p0 }
  0x1a   : > { %739 = vmatmul.mubr.msk.bf16.vlgmr.msra.gmra.mxu1 %vm265_vm0, %v805_v7  ;;  %v803_v13 = vld [vmem:[%s945_s27 + $0x38] sm:$0xff]   ;;  %v809_v14 = vld [vmem:[%s945_s27 + $0x68] sm:$0xff]   ;;  %v810_v15 = vld [vmem:[%s945_s27 + $0x70] sm:$0xff]  }
  0x1b   : > { %742 = vmatprep.mubr.msk.bf16.mxu1 %vm265_vm0, %v806_v8  ;;  %v811_v16 = vld [vmem:[%s945_s27 + $0x78] sm:$0xff]   ;;  %p822_p3 = pnand %p821_p2, %p815_p13 }
  0x20   : > { %727 = vmatmul.mubr.msk.bf16.gmra.mxu0 %vm265_vm0, %v799_v4 }
  0x21   : > { %730 = vmatprep.mubr.msk.bf16.mxu0 %vm265_vm0, %v800_v5 }
  0x22   : > { %743 = vmatmul.mubr.msk.bf16.gmra.mxu1 %vm265_vm0, %v807_v10 }
  0x23   : > { %746 = vmatprep.mubr.msk.bf16.mxu1 %vm265_vm0, %v808_v12 }
  0x28   : > { %731 = vmatmul.mubr.msk.bf16.gmra.mxu0 %vm265_vm0, %v801_v9 }
  0x29   : > { %734 = vmatprep.mubr.msk.bf16.mxu0 %vm265_vm0, %v802_v11 }
  0x2a   : > { %747 = vmatmul.mubr.msk.bf16.gmra.mxu1 %vm265_vm0, %v809_v14 }
  0x2b   : > { %750 = vmatprep.mubr.msk.bf16.mxu1 %vm265_vm0, %v810_v15 }
  0x30   : > { %735 = vmatmul.mubr.msk.bf16.gmra.mxu0 %vm265_vm0, %v803_v13 }
  0x32   : > { %751 = vmatmul.mubr.msk.bf16.gmra.mxu1 %vm265_vm0, %v811_v16 }
  0xd8   : > { %v724_v17 = vpop.f32.mrf.mxu0 }
  0xd9   : > { %v514_v26 = vmul.f32 %v724_v17, %v724_v17 }
  0xda   : > { %v348_v18 = vpop.f32.mrf.mxu0  ;;  %v979_v25 = vpop.f32.mrf.mxu1 }
  0xdb   : > { %v512_v21 = vmul.f32 %v348_v18, %v348_v18 }
  0xdc   : > { %v725_v19 = vpop.f32.mrf.mxu0  ;;  %v412_v30 = vpop.f32.mrf.mxu1 }
  0xdd   : > { %v515_v31 = vmul.f32 %v725_v19, %v725_v19 }
  0xde   : > { %v351_v20 = vpop.f32.mrf.mxu0  ;;  %v981_v35 = vpop.f32.mrf.mxu1 }
  0xdf   : > { %v475_v22 = vadd.f32 %v351_v20, %v348_v18  ;;  %v513_v23 = vmul.f32 %v351_v20, %v351_v20 }
  0xe0   : > { %v728_v24 = vpop.f32.mrf.mxu0  ;;  %v415_v40 = vpop.f32.mrf.mxu1 }
  0xe1   : > { %v476_v27 = vadd.f32 %v724_v17, %v475_v22  ;;  %v544_v28 = vadd.f32 %v513_v23, %v512_v21  ;;  %v518_v46 = vmul.f32 %v728_v24, %v728_v24 }
  0xe2   : > { %v364_v29 = vpop.f32.mrf.mxu0  ;;  %v983_v45 = vpop.f32.mrf.mxu1 }
  0xe3   : > { %v545_v32 = vadd.f32 %v544_v28, %v514_v26  ;;  %v477_v33 = vadd.f32 %v725_v19, %v476_v27  ;;  %v516_v37 = vmul.f32 %v364_v29, %v364_v29 }
  0xe4   : > { %v729_v34 = vpop.f32.mrf.mxu0  ;;  %v428_v54 = vpop.f32.mrf.mxu1 }
  0xe5   : > { %v478_v36 = vadd.f32 %v477_v33, %v364_v29  ;;  %v546_v38 = vadd.f32 %v545_v32, %v515_v31  ;;  %v519_v50 = vmul.f32 %v729_v34, %v729_v34  ;;  %v529_v29 = vmul.f32 %v415_v40, %v415_v40 }
  0xe6   : > { %v367_v39 = vpop.f32.mrf.mxu0  ;;  %v745_v63 = vpop.f32.mrf.mxu1  ;;  %v530_v33 = vmul.f32 %v979_v25, %v979_v25 }
  0xe7   : > { %v547_v41 = vadd.f32 %v546_v38, %v516_v37  ;;  %v479_v42 = vadd.f32 %v478_v36, %v367_v39  ;;  %v517_v43 = vmul.f32 %v367_v39, %v367_v39  ;;  %v531_v37 = vmul.f32 %v981_v35, %v981_v35 }
  0xe8   : > { %v732_v44 = vpop.f32.mrf.mxu0  ;;  %v431_v8 = vpop.f32.mrf.mxu1 }
  0xe9   : > { %v480_v47 = vadd.f32 %v728_v24, %v479_v42  ;;  %v548_v48 = vadd.f32 %v547_v41, %v517_v43  ;;  %v522_v0 = vmul.f32 %v732_v44, %v732_v44  ;;  %v528_v24 = vmul.f32 %v412_v30, %v412_v30 }
  0xea   : > { %v380_v49 = vpop.f32.mrf.mxu0  ;;  %v748_v16 = vpop.f32.mrf.mxu1  ;;  %v532_v43 = vmul.f32 %v428_v54, %v428_v54 }
  0xeb   : > { %v549_v51 = vadd.f32 %v548_v48, %v518_v46  ;;  %v481_v52 = vadd.f32 %v729_v34, %v480_v47  ;;  %v520_v56 = vmul.f32 %v380_v49, %v380_v49  ;;  %v533_v46 = vmul.f32 %v431_v8, %v431_v8 }
  0xec   : > { %v733_v53 = vpop.f32.mrf.mxu0  ;;  %v444_v23 = vpop.f32.mrf.mxu1  ;;  %v534_v48 = vmul.f32 %v983_v45, %v983_v45 }
  0xed   : > { %v482_v55 = vadd.f32 %v481_v52, %v380_v49  ;;  %v550_v57 = vadd.f32 %v549_v51, %v519_v50  ;;  %v523_v4 = vmul.f32 %v733_v53, %v733_v53  ;;  %v535_v50 = vmul.f32 %v745_v63, %v745_v63 }
  0xee   : > { %v383_v58 = vpop.f32.mrf.mxu0  ;;  %v749_v32 = vpop.f32.mrf.mxu1 }
  0xef   : > { %v551_v59 = vadd.f32 %v550_v57, %v520_v56  ;;  %v483_v60 = vadd.f32 %v482_v55, %v383_v58  ;;  %v521_v61 = vmul.f32 %v383_v58, %v383_v58 }
  0xf0   : > { %v736_v62 = vpop.f32.mrf.mxu0  ;;  %v447_v41 = vpop.f32.mrf.mxu1 }
  0xf1   : > { %v484_v1 = vadd.f32 %v732_v44, %v483_v60  ;;  %v552_v2 = vadd.f32 %v551_v59, %v521_v61  ;;  %v526_v17 = vmul.f32 %v736_v62, %v736_v62  ;;  %v537_v58 = vmul.f32 %v447_v41, %v447_v41 }
  0xf2   : > { %v396_v3 = vpop.f32.mrf.mxu0  ;;  %v752_v47 = vpop.f32.mrf.mxu1  ;;  %v538_v60 = vmul.f32 %v748_v16, %v748_v16 }
  0xf3   : > { %v553_v5 = vadd.f32 %v552_v2, %v522_v0  ;;  %v485_v6 = vadd.f32 %v733_v53, %v484_v1  ;;  %v524_v10 = vmul.f32 %v396_v3, %v396_v3  ;;  %v539_v0 = vmul.f32 %v749_v32, %v749_v32 }
  0xf4   : > { %v737_v7 = vpop.f32.mrf.mxu0  ;;  %v460_v53 = vpop.f32.mrf.mxu1 }
  0xf5   : > { %v486_v9 = vadd.f32 %v485_v6, %v396_v3  ;;  %v554_v11 = vadd.f32 %v553_v5, %v523_v4  ;;  %v527_v20 = vmul.f32 %v737_v7, %v737_v7  ;;  %v540_v4 = vmul.f32 %v460_v53, %v460_v53 }
  0xf6   : > { %v399_v12 = vpop.f32.mrf.mxu0  ;;  %v753_v59 = vpop.f32.mrf.mxu1 }
  0xf7   : > { %v555_v13 = vadd.f32 %v554_v11, %v524_v10  ;;  %v487_v14 = vadd.f32 %v486_v9, %v399_v12  ;;  %v525_v15 = vmul.f32 %v399_v12, %v399_v12  ;;  %v543_v11 = vmul.f32 %v753_v59, %v753_v59 }
  0xf8   : > { %v463_v3 = vpop.f32.mrf.mxu1 }
  0xf9   : > { %v488_v18 = vadd.f32 %v736_v62, %v487_v14  ;;  %v556_v19 = vadd.f32 %v555_v13, %v525_v15 }
  0xfb   : > { %v489_v21 = vadd.f32 %v737_v7, %v488_v18  ;;  %v557_v22 = vadd.f32 %v556_v19, %v526_v17  ;;  %v541_v7 = vmul.f32 %v463_v3, %v463_v3 }
  0xfd   : > { %v558_v26 = vadd.f32 %v557_v22, %v527_v20  ;;  %v490_v27 = vadd.f32 %v489_v21, %v412_v30 }
  0xff   : > { %v491_v28 = vadd.f32 %v490_v27, %v415_v40  ;;  %v559_v31 = vadd.f32 %v558_v26, %v528_v24 }
 0x101   : > { %v492_v34 = vadd.f32 %v979_v25, %v491_v28  ;;  %v560_v36 = vadd.f32 %v559_v31, %v529_v29 }
 0x103   : > { %v561_v38 = vadd.f32 %v560_v36, %v530_v33  ;;  %v493_v39 = vadd.f32 %v981_v35, %v492_v34  ;;  %v536_v35 = vmul.f32 %v444_v23, %v444_v23 }
 0x105   : > { %v494_v42 = vadd.f32 %v493_v39, %v428_v54  ;;  %v562_v30 = vadd.f32 %v561_v38, %v531_v37 }
 0x107   : > { %v563_v44 = vadd.f32 %v562_v30, %v532_v43  ;;  %v495_v40 = vadd.f32 %v494_v42, %v431_v8  ;;  %v542_v8 = vmul.f32 %v752_v47, %v752_v47 }
 0x109   : > { %v496_v25 = vadd.f32 %v983_v45, %v495_v40  ;;  %v564_v49 = vadd.f32 %v563_v44, %v533_v46 }
 0x10b   : > { %v565_v51 = vadd.f32 %v564_v49, %v534_v48  ;;  %v497_v52 = vadd.f32 %v745_v63, %v496_v25 }
 0x10d   : > { %v498_v55 = vadd.f32 %v497_v52, %v444_v23  ;;  %v566_v56 = vadd.f32 %v565_v51, %v535_v50 }
 0x10f   : > { %v567_v57 = vadd.f32 %v566_v56, %v536_v35  ;;  %v499_v54 = vadd.f32 %v498_v55, %v447_v41 }
 0x111   : > { %v500_v61 = vadd.f32 %v748_v16, %v499_v54  ;;  %v568_v62 = vadd.f32 %v567_v57, %v537_v58 }
 0x113   : > { %v569_v1 = vadd.f32 %v568_v62, %v538_v60  ;;  %v501_v2 = vadd.f32 %v749_v32, %v500_v61 }
 0x115   : > { %v502_v45 = vadd.f32 %v501_v2, %v460_v53  ;;  %v570_v5 = vadd.f32 %v569_v1, %v539_v0 }
 0x117   : > { %v571_v63 = vadd.f32 %v570_v5, %v540_v4  ;;  %v503_v6 = vadd.f32 %v502_v45, %v463_v3 }
 0x119   : > { %v504_v9 = vadd.f32 %v752_v47, %v503_v6  ;;  %v572_v10 = vadd.f32 %v571_v63, %v541_v7 }
 0x11b   : > { %v505_v12 = vadd.f32 %v753_v59, %v504_v9  ;;  %v573_v13 = vadd.f32 %v572_v10, %v542_v8 }
 0x11d   : > { %v506_v14 = vrot.slane %v505_v12, 4  ;;  %v574_v15 = vadd.f32 %v573_v13, %v543_v11 }
 0x11f   : > { %v507_v16 = vadd.f32 %v506_v14, %v505_v12  ;;  %v575_v17 = vrot.slane %v574_v15, 4 }
 0x121   : > { %v508_v18 = vrot.slane %v507_v16, 2  ;;  %v576_v19 = vadd.f32 %v575_v17, %v574_v15 }
 0x123   : > { %v509_v20 = vadd.f32 %v508_v18, %v507_v16  ;;  %v577_v21 = vrot.slane %v576_v19, 2 }
 0x125   : > { %v510_v22 = vrot.slane %v509_v20, 1  ;;  %v578_v23 = vadd.f32 %v577_v21, %v576_v19 }
 0x127   : > { %v579_v24 = vrot.slane %v578_v23, 1  ;;  %v511_v26 = vadd.f32 %v510_v22, %v509_v20 }
 0x129   : > { %v580_v27 = vadd.f32 %v579_v24, %v578_v23 }
 0x12b   : > { %v582_v28 = vsel %vm581_vm1, %v511_v26, %v580_v27 }
 0x12c   : > { %v584_v29 = vsel %vm583_vm2, %v582_v28, 0.0 }
 0x12d   : > { %585 = vst [vmem:[%s137_s3] sm:$0xff] %v584_v29 }
 0x12e   : > { %825 = shalt.err (!%p822_p3)
}
 0x12f   : > { %s826_s21 = scalar_lea.hbm %s999_s7, 128  ;;  %s830_s24 = scalar_lea.hbm %s1036_s2, 256 }
 0x130   : > { %p827_p4 = scmp.ne.s32.totalorder %s999_s7, %s826_s21  ;;  %p831_p9 = scmp.lt.s32.totalorder %s999_s7, %s1036_s2 }
 0x131   : > { %p832_p10 = scmp.lt.s32.totalorder %s830_s24, %s826_s21 }
 0x132   : > { %p828_p7 = pnand %p827_p4, %p928_p5 }
 0x133   : > { %p833_p11 = por %p832_p10, %p831_p9 }
 0x134   : > { %p829_p8 = pneg %p828_p7 }
 0x136   : > { %p834_p12 = pnand %p833_p11, %p829_p8 }
 0x138   : > { %837 = shalt.err (!%p834_p12)
}
 0x139   : > { %756 = dma.vmem_to_hbm [thread:$0]  (%p928_p5), %s601_s4, 128, %s999_s7, %s587_s8  }
 0x13a PF: > { %p762_p13 = scmp.ge.s32.totalorder %s872_s12, 2  ;;  %s612_s27 = sand.u32 1, %s860_s9  }
 0x13b   : > { %s613_s28 = scalar_lea.sflag [#allocation3], %s612_s27 }
 0x13c   : > { %p759_p0 = pnand %p762_p13, %p932_p6 }
 0x13e   : > { %p760_p1 = pneg %p759_p0 }
 0x140   : > { %855 = dma.done.wait (%p760_p1), %s613_s28, 128  }
 0x141   : > { %857 = vsyncadd (%p760_p1), %s613_s28, 4294967168  ;;  %p12_p2 = scmp.ge.s32.totalorder %s915_s15, 4   ;;  %s1039_s9 = smov %s864_s10 }
 0x142   : > { %s1040_s10 = smov %s868_s11  ;;  %s1041_s11 = smov %s926_s18 }
 0x143   : > { %s1042_s12 = smov %s915_s15  ;;  %14 = sbr.rel (!%p12_p2) target bundleno = 3 (0x3), region = 63 }
 0x148   :  { %618 = vsyncpa [#allocation3], 1 }
 0x149   :  { %620 = vsyncpa [#allocation3 + $0x1], 1 }

</bundles_post_ra>
